<compile_context>
chip_gen: v6e
topology: v6e:2x2x1
jax: 0.10.0
libtpu: 0.0.40
codegen_flags: <defaults>
</compile_context>

<pallas_src>
import functools

import jax
import jax.numpy as jnp
from jax.experimental import pallas as pl
from jax.experimental.pallas import tpu as pltpu


def _round_up(x, m):
    return ((x + m - 1) // m) * m


def _fused_mlp_kernel(x_ref, m_ref, *rest, n_layers, eps):
    """rest = (w0, b0, w1, b1, ..., w_{L-1}, b_{L-1}, o_ref)."""
    o_ref = rest[-1]
    wb = rest[:-1]

    act_dtype = x_ref.dtype
    y = x_ref[...]                                    # native dtype -> MXU fast path
    mask = m_ref[...].astype(jnp.float32)             # (TM, 1)

    for li in range(n_layers):
        w = wb[2 * li][...]                           # (Din, Dout), native dtype
        b = wb[2 * li + 1][...].astype(jnp.float32)   # (1, Dout)
        # Conv1d(kernel_size=1, bias=True) == per-position linear; f32 accumulate.
        y = jnp.dot(y, w, preferred_element_type=jnp.float32) + b
        if li < n_layers - 1:
            # TODO(synk): reference `layer_norm(features, masks)` is not defined in
            # the provided source; implemented as per-position LayerNorm over the
            # channel dim (no affine params) with masked positions zeroed.
            mean = jnp.mean(y, axis=-1, keepdims=True)
            c = y - mean
            var = jnp.mean(c * c, axis=-1, keepdims=True)
            inv = jax.lax.rsqrt(var + eps) * mask     # fold mask into the LN scale
            y = jnp.maximum(c * inv, 0.0)             # LN + mask + ReLU
            y = y.astype(act_dtype)                   # keep bf16 MXU path next layer

    o_ref[...] = y.astype(o_ref.dtype)


def multilayer_perceptron(features, masks, params, *, tm=256, eps=1e-5):
    """features: (B, N, D0) channels-last; masks: (B, N). Returns (B, N, D_last)."""
    B, N, D0 = features.shape
    M = B * N
    x = features.reshape(M, D0)
    m = masks.reshape(M, 1).astype(features.dtype)

    n_layers = len(params)
    d_out = params[-1][1].shape[0]

    # Lane-dense output stores: pad the final layer's Dout to a multiple of 128
    # with zero weight/bias columns (safe: no LN on the output layer), slice later.
    d_out_pad = _round_up(max(d_out, 128), 128)
    w_last, b_last = params[-1]
    if d_out_pad != d_out:
        w_last = jnp.pad(w_last, ((0, 0), (0, d_out_pad - d_out)))
        b_last = jnp.pad(b_last, (0, d_out_pad - d_out))
    layer_params = list(params[:-1]) + [(w_last, b_last)]

    # Row tiling: single grid step for small problems, otherwise tiles of `tm`.
    tm_eff = _round_up(M, 8) if M <= tm else tm
    Mp = _round_up(M, tm_eff)
    if Mp != M:
        x = jnp.pad(x, ((0, Mp - M), (0, 0)))
        m = jnp.pad(m, ((0, Mp - M), (0, 0)))   # padded rows are masked out

    in_specs = [
        pl.BlockSpec((tm_eff, D0), lambda i: (i, 0)),  # activation row tile
        pl.BlockSpec((tm_eff, 1), lambda i: (i, 0)),   # mask row tile
    ]
    operands = [x, m]
    for (w, b) in layer_params:
        din, dout = w.shape
        in_specs.append(pl.BlockSpec((din, dout), lambda i: (0, 0)))  # VMEM-resident W
        in_specs.append(pl.BlockSpec((1, dout), lambda i: (0, 0)))    # VMEM-resident b
        operands.append(w)
        operands.append(b.reshape(1, dout))

    kernel = functools.partial(_fused_mlp_kernel, n_layers=n_layers, eps=eps)
    out = pl.pallas_call(
        kernel,
        out_shape=jax.ShapeDtypeStruct((Mp, d_out_pad), features.dtype),
        grid_spec=pltpu.PrefetchScalarGridSpec(
            num_scalar_prefetch=0,
            grid=(Mp // tm_eff,),
            in_specs=in_specs,
            out_specs=pl.BlockSpec((tm_eff, d_out_pad), lambda i: (i, 0)),
        ),
        compiler_params=pltpu.CompilerParams(
            dimension_semantics=("parallel",),
        ),
    )(*operands)

    return out[:M, :d_out].reshape(B, N, d_out)


def init_mlp_params(key, layer_dim, dtype=jnp.float32):
    """Deterministic Conv1d(kernel_size=1) weights/biases, stored as (Din, Dout)."""
    params = []
    for i in range(1, len(layer_dim)):
        din, dout = layer_dim[i - 1], layer_dim[i]
        key, kw, kb = jax.random.split(key, 3)
        bound = 1.0 / jnp.sqrt(jnp.asarray(din, dtype))
        w = jax.random.uniform(kw, (din, dout), dtype, -bound, bound)
        b = jax.random.uniform(kb, (dout,), dtype, -bound, bound)
        params.append((w, b))
    return params


def _mlp_reference(features, masks, params, eps=1e-5):
    """Pure-JAX reference (same assumed layer_norm semantics)."""
    B, N, D0 = features.shape
    x = features.reshape(B * N, D0).astype(jnp.float32)
    m = masks.reshape(B * N, 1).astype(jnp.float32)
    n = len(params)
    for li, (w, b) in enumerate(params):
        x = x @ w.astype(jnp.float32) + b.astype(jnp.float32)
        if li < n - 1:
            mean = x.mean(-1, keepdims=True)
            var = ((x - mean) ** 2).mean(-1, keepdims=True)
            x = (x - mean) * jax.lax.rsqrt(var + eps) * m
            x = jnp.maximum(x, 0.0)
    return x.reshape(B, N, -1).astype(features.dtype)


if __name__ == "__main__":
    key = jax.random.PRNGKey(0)
    kx, kp = jax.random.split(key)

    B, N = 2, 16
    layer_dim = [8, 32, 32, 16]  # D0 -> hidden -> hidden -> D_out

    features = jax.random.normal(kx, (B, N, layer_dim[0]), jnp.float32)
    # Valid-position mask: zero out the last 3 positions of batch 1.
    masks = jnp.ones((B, N), jnp.float32)
    masks = masks.at[1, N - 3:].set(0.0)

    params = init_mlp_params(kp, layer_dim)

    out = multilayer_perceptron(features, masks, params)
    out = jax.block_until_ready(out)
    assert out.shape == (B, N, layer_dim[-1])

    ref = _mlp_reference(features, masks, params)
    assert jnp.allclose(out, ref, rtol=1e-4, atol=1e-4), "mismatch vs reference"

    print("KERNEL_OK")
</pallas_src>

<mosaic_0001>
module attributes {stable_mosaic.version = 11 : i64} {
  func.func @_fused_mlp_kernel(%arg0: i32, %arg1: memref<32x8xf32, #tpu.memory_space<vmem>>, %arg2: memref<32x1xf32, #tpu.memory_space<vmem>>, %arg3: memref<8x32xf32, #tpu.memory_space<vmem>>, %arg4: memref<1x32xf32, #tpu.memory_space<vmem>>, %arg5: memref<32x32xf32, #tpu.memory_space<vmem>>, %arg6: memref<1x32xf32, #tpu.memory_space<vmem>>, %arg7: memref<32x128xf32, #tpu.memory_space<vmem>>, %arg8: memref<1x128xf32, #tpu.memory_space<vmem>>, %arg9: memref<32x128xf32, #tpu.memory_space<vmem>>) attributes {dimension_semantics = [#tpu.dimension_semantics<parallel>], iteration_bounds = array<i64: 1>, scalar_prefetch = 0 : i64, scratch_operands = 0 : i64, tpu.core_type = #tpu.core_type<tc>, window_params = [{transform_indices = @transform_0, window_bounds = array<i64: 32, 8>}, {transform_indices = @transform_1, window_bounds = array<i64: 32, 1>}, {pipeline_mode = #tpu.pipeline_mode<synchronous>, transform_indices = @transform_2, window_bounds = array<i64: 8, 32>}, {pipeline_mode = #tpu.pipeline_mode<synchronous>, transform_indices = @transform_3, window_bounds = array<i64: 1, 32>}, {pipeline_mode = #tpu.pipeline_mode<synchronous>, transform_indices = @transform_4, window_bounds = array<i64: 32, 32>}, {pipeline_mode = #tpu.pipeline_mode<synchronous>, transform_indices = @transform_5, window_bounds = array<i64: 1, 32>}, {pipeline_mode = #tpu.pipeline_mode<synchronous>, transform_indices = @transform_6, window_bounds = array<i64: 32, 128>}, {pipeline_mode = #tpu.pipeline_mode<synchronous>, transform_indices = @transform_7, window_bounds = array<i64: 1, 128>}, {transform_indices = @transform_8, window_bounds = array<i64: 32, 128>}]} {
    %c0 = arith.constant 0 : index
    %c0_0 = arith.constant 0 : index
    %0 = vector.load %arg1[%c0, %c0_0] : memref<32x8xf32, #tpu.memory_space<vmem>>, vector<32x8xf32>
    %c0_1 = arith.constant 0 : index
    %c0_2 = arith.constant 0 : index
    %1 = vector.load %arg2[%c0_1, %c0_2] : memref<32x1xf32, #tpu.memory_space<vmem>>, vector<32x1xf32>
    %c0_3 = arith.constant 0 : index
    %c0_4 = arith.constant 0 : index
    %2 = vector.load %arg3[%c0_3, %c0_4] : memref<8x32xf32, #tpu.memory_space<vmem>>, vector<8x32xf32>
    %c0_5 = arith.constant 0 : index
    %c0_6 = arith.constant 0 : index
    %3 = vector.load %arg4[%c0_5, %c0_6] : memref<1x32xf32, #tpu.memory_space<vmem>>, vector<1x32xf32>
    %cst = arith.constant dense<0.000000e+00> : vector<32x32xf32>
    %4 = tpu.matmul %0, %2, %cst {dimension_numbers = #tpu.dot_dimension_numbers<[1], [0], [0], [1], [0, 0, 1, 1], [], []>} : vector<32x8xf32>, vector<8x32xf32>, vector<32x32xf32> -> vector<32x32xf32>
    %5 = vector.broadcast %3 : vector<1x32xf32> to vector<32x32xf32>
    %6 = arith.addf %4, %5 : vector<32x32xf32>
    %cst_7 = arith.constant dense<0.000000e+00> : vector<32xf32>
    %7 = vector.multi_reduction <add>, %6, %cst_7 [1] : vector<32x32xf32> to vector<32xf32>
    %8 = vector.shape_cast %7 : vector<32xf32> to vector<32x1xf32>
    %cst_8 = arith.constant 3.200000e+01 : f32
    %9 = vector.broadcast %cst_8 : f32 to vector<32x1xf32>
    %10 = arith.divf %8, %9 : vector<32x1xf32>
    %11 = vector.broadcast %10 : vector<32x1xf32> to vector<32x32xf32>
    %12 = arith.subf %6, %11 : vector<32x32xf32>
    %13 = arith.mulf %12, %12 : vector<32x32xf32>
    %cst_9 = arith.constant dense<0.000000e+00> : vector<32xf32>
    %14 = vector.multi_reduction <add>, %13, %cst_9 [1] : vector<32x32xf32> to vector<32xf32>
    %15 = vector.shape_cast %14 : vector<32xf32> to vector<32x1xf32>
    %cst_10 = arith.constant 3.200000e+01 : f32
    %16 = vector.broadcast %cst_10 : f32 to vector<32x1xf32>
    %17 = arith.divf %15, %16 : vector<32x1xf32>
    %cst_11 = arith.constant 9.99999974E-6 : f32
    %18 = vector.broadcast %cst_11 : f32 to vector<32x1xf32>
    %19 = arith.addf %17, %18 : vector<32x1xf32>
    %20 = math.rsqrt %19 : vector<32x1xf32>
    %21 = arith.mulf %20, %1 : vector<32x1xf32>
    %22 = vector.broadcast %21 : vector<32x1xf32> to vector<32x32xf32>
    %23 = arith.mulf %12, %22 : vector<32x32xf32>
    %cst_12 = arith.constant 0.000000e+00 : f32
    %24 = vector.broadcast %cst_12 : f32 to vector<32x32xf32>
    %25 = arith.maximumf %23, %24 : vector<32x32xf32>
    %c0_13 = arith.constant 0 : index
    %c0_14 = arith.constant 0 : index
    %26 = vector.load %arg5[%c0_13, %c0_14] : memref<32x32xf32, #tpu.memory_space<vmem>>, vector<32x32xf32>
    %c0_15 = arith.constant 0 : index
    %c0_16 = arith.constant 0 : index
    %27 = vector.load %arg6[%c0_15, %c0_16] : memref<1x32xf32, #tpu.memory_space<vmem>>, vector<1x32xf32>
    %cst_17 = arith.constant dense<0.000000e+00> : vector<32x32xf32>
    %28 = tpu.matmul %25, %26, %cst_17 {dimension_numbers = #tpu.dot_dimension_numbers<[1], [0], [0], [1], [0, 0, 1, 1], [], []>} : vector<32x32xf32>, vector<32x32xf32>, vector<32x32xf32> -> vector<32x32xf32>
    %29 = vector.broadcast %27 : vector<1x32xf32> to vector<32x32xf32>
    %30 = arith.addf %28, %29 : vector<32x32xf32>
    %cst_18 = arith.constant dense<0.000000e+00> : vector<32xf32>
    %31 = vector.multi_reduction <add>, %30, %cst_18 [1] : vector<32x32xf32> to vector<32xf32>
    %32 = vector.shape_cast %31 : vector<32xf32> to vector<32x1xf32>
    %cst_19 = arith.constant 3.200000e+01 : f32
    %33 = vector.broadcast %cst_19 : f32 to vector<32x1xf32>
    %34 = arith.divf %32, %33 : vector<32x1xf32>
    %35 = vector.broadcast %34 : vector<32x1xf32> to vector<32x32xf32>
    %36 = arith.subf %30, %35 : vector<32x32xf32>
    %37 = arith.mulf %36, %36 : vector<32x32xf32>
    %cst_20 = arith.constant dense<0.000000e+00> : vector<32xf32>
    %38 = vector.multi_reduction <add>, %37, %cst_20 [1] : vector<32x32xf32> to vector<32xf32>
    %39 = vector.shape_cast %38 : vector<32xf32> to vector<32x1xf32>
    %cst_21 = arith.constant 3.200000e+01 : f32
    %40 = vector.broadcast %cst_21 : f32 to vector<32x1xf32>
    %41 = arith.divf %39, %40 : vector<32x1xf32>
    %cst_22 = arith.constant 9.99999974E-6 : f32
    %42 = vector.broadcast %cst_22 : f32 to vector<32x1xf32>
    %43 = arith.addf %41, %42 : vector<32x1xf32>
    %44 = math.rsqrt %43 : vector<32x1xf32>
    %45 = arith.mulf %44, %1 : vector<32x1xf32>
    %46 = vector.broadcast %45 : vector<32x1xf32> to vector<32x32xf32>
    %47 = arith.mulf %36, %46 : vector<32x32xf32>
    %cst_23 = arith.constant 0.000000e+00 : f32
    %48 = vector.broadcast %cst_23 : f32 to vector<32x32xf32>
    %49 = arith.maximumf %47, %48 : vector<32x32xf32>
    %c0_24 = arith.constant 0 : index
    %c0_25 = arith.constant 0 : index
    %50 = vector.load %arg7[%c0_24, %c0_25] : memref<32x128xf32, #tpu.memory_space<vmem>>, vector<32x128xf32>
    %c0_26 = arith.constant 0 : index
    %c0_27 = arith.constant 0 : index
    %51 = vector.load %arg8[%c0_26, %c0_27] : memref<1x128xf32, #tpu.memory_space<vmem>>, vector<1x128xf32>
    %cst_28 = arith.constant dense<0.000000e+00> : vector<32x128xf32>
    %52 = tpu.matmul %49, %50, %cst_28 {dimension_numbers = #tpu.dot_dimension_numbers<[1], [0], [0], [1], [0, 0, 1, 1], [], []>} : vector<32x32xf32>, vector<32x128xf32>, vector<32x128xf32> -> vector<32x128xf32>
    %53 = vector.broadcast %51 : vector<1x128xf32> to vector<32x128xf32>
    %54 = arith.addf %52, %53 : vector<32x128xf32>
    %c0_29 = arith.constant 0 : index
    %c0_30 = arith.constant 0 : index
    %55 = vector.load %arg9[%c0_29, %c0_30] : memref<32x128xf32, #tpu.memory_space<vmem>>, vector<32x128xf32>
    tpu.vector_store %arg9[%c0_29, %c0_30], %54 {strides = array<i32>} : memref<32x128xf32, #tpu.memory_space<vmem>>, vector<32x128xf32>,
    return
  }
  func.func @transform_0(%arg0: i32) -> (i32, i32) {
    %c0_i32 = arith.constant 0 : i32
    %c0_i32_0 = arith.constant 0 : i32
    return %arg0, %c0_i32 : i32, i32
  }
  func.func @transform_1(%arg0: i32) -> (i32, i32) {
    %c0_i32 = arith.constant 0 : i32
    %c0_i32_0 = arith.constant 0 : i32
    return %arg0, %c0_i32 : i32, i32
  }
  func.func @transform_2(%arg0: i32) -> (i32, i32) {
    %c0_i32 = arith.constant 0 : i32
    %c0_i32_0 = arith.constant 0 : i32
    %c0_i32_1 = arith.constant 0 : i32
    return %c0_i32, %c0_i32_0 : i32, i32
  }
  func.func @transform_3(%arg0: i32) -> (i32, i32) {
    %c0_i32 = arith.constant 0 : i32
    %c0_i32_0 = arith.constant 0 : i32
    %c0_i32_1 = arith.constant 0 : i32
    return %c0_i32, %c0_i32_0 : i32, i32
  }
  func.func @transform_4(%arg0: i32) -> (i32, i32) {
    %c0_i32 = arith.constant 0 : i32
    %c0_i32_0 = arith.constant 0 : i32
    %c0_i32_1 = arith.constant 0 : i32
    return %c0_i32, %c0_i32_0 : i32, i32
  }
  func.func @transform_5(%arg0: i32) -> (i32, i32) {
    %c0_i32 = arith.constant 0 : i32
    %c0_i32_0 = arith.constant 0 : i32
    %c0_i32_1 = arith.constant 0 : i32
    return %c0_i32, %c0_i32_0 : i32, i32
  }
  func.func @transform_6(%arg0: i32) -> (i32, i32) {
    %c0_i32 = arith.constant 0 : i32
    %c0_i32_0 = arith.constant 0 : i32
    %c0_i32_1 = arith.constant 0 : i32
    return %c0_i32, %c0_i32_0 : i32, i32
  }
  func.func @transform_7(%arg0: i32) -> (i32, i32) {
    %c0_i32 = arith.constant 0 : i32
    %c0_i32_0 = arith.constant 0 : i32
    %c0_i32_1 = arith.constant 0 : i32
    return %c0_i32, %c0_i32_0 : i32, i32
  }
  func.func @transform_8(%arg0: i32) -> (i32, i32) {
    %c0_i32 = arith.constant 0 : i32
    %c0_i32_0 = arith.constant 0 : i32
    return %arg0, %c0_i32 : i32, i32
  }
}

</mosaic_0001>

<bundles_post_ra>
// kernel: tpu_custom_call.1
= control target key start
LH: loop header
LB: loop body
LE: loop exit
PB: predicated region body
PF: predicated region fallthrough
CT: control target
= control target key end

     0   :  { %vm46_vm0 = vcmask 64512   ;;  %s835_s0 = inlined_call_operand.vmem [shape: f32[32,8], index: 0, kind: input, shape index: {}]   ;;  %s836_s1 = inlined_call_operand.vmem [shape: f32[32,1], index: 1, kind: input, shape index: {}]   ;;  %s837_s2 = inlined_call_operand.vmem [shape: f32[8,32], index: 2, kind: input, shape index: {}]   ;;  %s838_s3 = inlined_call_operand.vmem [shape: f32[1,32], index: 3, kind: input, shape index: {}]   ;;  %s839_s4 = inlined_call_operand.vmem [shape: f32[32,32], index: 4, kind: input, shape index: {}]   ;;  %s840_s5 = inlined_call_operand.vmem [shape: f32[1,32], index: 5, kind: input, shape index: {}]   ;;  %s841_s6 = inlined_call_operand.vmem [shape: f32[32,128], index: 6, kind: input, shape index: {}]   ;;  %s842_s7 = inlined_call_operand.vmem [shape: f32[1,128], index: 7, kind: input, shape index: {}]   ;;  %s843_s8 = inlined_call_operand.hbm [shape: f32[32,128], index: 8, kind: output, shape index: {}]  }
   0x1   :  { %v38_v0 = vld [vmem:[%s837_s2] sm:$0xff]  ;;  %v31_v2 = vld [vmem:[%s835_s0 + $0x8] sm:$0xff]  ;;  %v32_v3 = vld [vmem:[%s835_s0 + $0x10] sm:$0xff] }
   0x2   :  { %v30_v1 = vld [vmem:[%s835_s0] sm:$0xff]  ;;  %578 = vmatprep.subr.mxu0 %v38_v0 }
   0x3   :  { %580 = vmatprep.mubr.msk.f32.mxu0 %vm46_vm0, %v30_v1 }
   0x4   :  { %13 = vsyncpa [#allocation3], 0  ;;  %579 = vmatpush3.msra.mxu0 %v38_v0  ;;  %v33_v4 = vld [vmem:[%s835_s0 + $0x18] sm:$0xff]  ;;  %v542_v6 = vld [vmem:[%s838_s3] ss:$0 sm:$0xff]  ;;  %vm144_vm1 = vcmask 261120  }
   0x5   :  { %581 = vmatmul.mubr.msk.f32.vlgmr.msra.gmra.mxu0 %vm46_vm0, %v31_v2  ;;  %v658_v38 = vmov 0   ;;  %v752_v51 = vld [vmem:[%s836_s1] sm:$0xff]  ;;  %v229_v52 = vld [vmem:[%s839_s4 + $0x18] sm:$0xff]  ;;  %v228_v55 = vld [vmem:[%s839_s4 + $0x10] sm:$0xff]  ;;  %s659_s15 = smov [#allocation2]  }
   0x6   :  { %583 = vmatprep.mubr.msk.f32.mxu0 %vm46_vm0, %v32_v3  ;;  %618 = vset.pattern.permute.xlu0 %v658_v38  ;;  %v764_v56 = vld [vmem:[%s836_s1 + $0x8] sm:$0xff]  ;;  %v226_v60 = vld [vmem:[%s839_s4] sm:$0xff]  ;;  %v776_v62 = vld [vmem:[%s836_s1 + $0x10] sm:$0xff]  ;;  %s531_s0 = sshll.u32 %s659_s15, 4  ;;  %s532_s0 = int_to_ptr.vmem [resolvable:$true] %s531_s0 }
   0x7   :  { %619 = vset.pattern.permute.xlu1 %v658_v38  ;;  %586 = vmatprep.subr.mxu1 %v229_v52  ;;  %v227_v57 = vld [vmem:[%s839_s4 + $0x8] sm:$0xff]  ;;  %v782_v1 = vld [vmem:[%s836_s1 + $0x18] sm:$0xff]  ;;  %s636_s3 = scalar_lea.vmem %s532_s0, 512  ;;  %p641_p1 = scmp.lt.s32.totalorder %s532_s0, %s532_s0 }
   0x8   :  { %587 = vmatpush3.msra.mxu1 %v229_v52  ;;  %p637_p0 = scmp.ne.s32.totalorder %s532_s0, %s636_s3  ;;  %p642_p2 = scmp.lt.s32.totalorder %s636_s3, %s636_s3 }
   0x9   :  { %584 = vmatmul.mubr.msk.f32.gmra.mxu0 %vm46_vm0, %v33_v4  ;;  %588 = vmatprep.subr.mxu1 %v228_v55 }
   0xa   :  { %589 = vmatpush3.msra.mxu1 %v228_v55  ;;  %p643_p3 = por %p642_p2, %p641_p1 }
   0xb   :  { %590 = vmatprep.subr.mxu1 %v227_v57 }
   0xc   :  { %591 = vmatpush3.msra.mxu1 %v227_v57  ;;  %p644_p4 = pnand %p643_p3, %p637_p0 }
   0xd   :  { %592 = vmatprep.subr.mxu1 %v226_v60 }
   0xe   :  { %593 = vmatpush3.msra.mxu1 %v226_v60 }
  0xc5   :  { %v582_v5 = vpop.f32.mrf.mxu0 }
  0xc6   :  { %v131_v10 = vadd.f32 %v582_v5, %v542_v6 }
  0xc7   :  { %v125_v7 = vpop.f32.mrf.mxu0 }
  0xc8   :  { %v126_v8 = vadd.f32 %v542_v6, %v125_v7  ;;  %v148_v16 = vsel %vm144_vm1, %v131_v10, 0.0 }
  0xc9   :  { %v585_v9 = vpop.f32.mrf.mxu0 }
  0xca   :  { %v145_v11 = vsel %vm144_vm1, %v126_v8, 0.0  ;;  %v141_v14 = vadd.f32 %v585_v9, %v542_v6 }
  0xcb   :  { %v135_v12 = vpop.f32.mrf.mxu0  ;;  %146 = vadd.xlane.f32.xlu0 %v145_v11 }
  0xcc   :  { %v136_v13 = vadd.f32 %v542_v6, %v135_v12  ;;  %v154_v17 = vsel %vm144_vm1, %v141_v14, 0.0 }
  0xce   :  { %v151_v15 = vsel %vm144_vm1, %v136_v13, 0.0 }
  0xcf   :  { %152 = vadd.xlane.f32.xlu1 %v151_v15  ;;  %149 = vadd.xlane.f32.xlu0 %v148_v16  ;;  %v547_v15 = vld [vmem:[%s840_s5] ss:$0 sm:$0xff] }
  0xd3   :  { %155 = vadd.xlane.f32.xlu1 %v154_v17 }
 0x154   :  { %v147_v18 = vpop.xlane.xlu0 %146 }
 0x155   :  { %v158_v19 = vmul.f32 0.03125, %v147_v18 }
 0x157   :  { %v729_v20 = vsub.f32 %v126_v8, %v158_v19 }
 0x158   :  { %v153_v21 = vpop.xlane.xlu1 %152  ;;  %v150_v22 = vpop.xlane.xlu0 %149 }
 0x159   :  { %v160_v23 = vmul.f32 0.03125, %v153_v21  ;;  %v159_v24 = vmul.f32 0.03125, %v150_v22  ;;  %v166_v25 = vmul.f32 %v729_v20, %v729_v20 }
 0x15b   :  { %v733_v26 = vsub.f32 %v136_v13, %v160_v23  ;;  %v735_v27 = vsub.f32 %v131_v10, %v159_v24  ;;  %v170_v28 = vsel %vm144_vm1, %v166_v25, 0.0 }
 0x15c   :  { %v156_v29 = vpop.xlane.xlu1 %155  ;;  %171 = vadd.xlane.f32.xlu0 %v170_v28 }
 0x15d   :  { %v161_v30 = vmul.f32 0.03125, %v156_v29  ;;  %v168_v31 = vmul.f32 %v733_v26, %v733_v26  ;;  %v167_v32 = vmul.f32 %v735_v27, %v735_v27 }
 0x15f   :  { %v742_v33 = vsub.f32 %v141_v14, %v161_v30  ;;  %v176_v34 = vsel %vm144_vm1, %v168_v31, 0.0  ;;  %v173_v35 = vsel %vm144_vm1, %v167_v32, 0.0 }
 0x160   :  { %177 = vadd.xlane.f32.xlu0 %v176_v34  ;;  %174 = vadd.xlane.f32.xlu1 %v173_v35 }
 0x161   :  { %v169_v36 = vmul.f32 %v742_v33, %v742_v33 }
 0x163   :  { %v179_v37 = vsel %vm144_vm1, %v169_v36, 0.0 }
 0x164   :  { %180 = vadd.xlane.f32.xlu1 %v179_v37 }
 0x1e5   :  { %v172_v39 = vpop.xlane.xlu0 %171 }
 0x1e6   :  { %v182_v40 = vmul.f32 0.03125, %v172_v39 }
 0x1e8   :  { %v186_v41 = vadd.f32 1e-05, %v182_v40 }
 0x1e9   :  { %v175_v42 = vpop.xlane.xlu1 %174  ;;  %v178_v43 = vpop.xlane.xlu0 %177 }
 0x1ea   :  { %620 = vrsqrt.f32 %v186_v41  ;;  %v183_v44 = vmul.f32 0.03125, %v175_v42  ;;  %v184_v45 = vmul.f32 0.03125, %v178_v43 }
 0x1ec   :  { %v187_v46 = vadd.f32 1e-05, %v183_v44  ;;  %v188_v47 = vadd.f32 1e-05, %v184_v45 }
 0x1ed   :  { %v181_v48 = vpop.xlane.xlu1 %180 }
 0x1ee   :  { %622 = vrsqrt.f32 %v187_v46  ;;  %v185_v49 = vmul.f32 0.03125, %v181_v48 }
 0x1ef   :  { %624 = vrsqrt.f32 %v188_v47 }
 0x1f0   :  { %v189_v50 = vadd.f32 1e-05, %v185_v49 }
 0x1f2   :  { %626 = vrsqrt.f32 %v189_v50 }
 0x1f7   :  { %v621_v53 = vpop.eup %620 }
 0x1f8   :  { %v194_v54 = vmul.f32 %v621_v53, %v752_v51 }
 0x1fa   :  { %200 = vperm.xlu0 %618, %v194_v54  }
 0x1fb   :  { %v623_v58 = vpop.eup %622 }
 0x1fc   :  { %v195_v59 = vmul.f32 %v623_v58, %v764_v56  ;;  %v625_v61 = vpop.eup %624 }
 0x1fd   :  { %v196_v63 = vmul.f32 %v625_v61, %v776_v62 }
 0x1fe   :  { %205 = vperm.xlu1 %619, %v195_v59  }
 0x1ff   :  { %v627_v0 = vpop.eup %626 }
 0x200   :  { %v197_v2 = vmul.f32 %v627_v0, %v782_v1 }
 0x202   :  { %210 = vperm.xlu1 %619, %v196_v63   ;;  %v417_v63 = vld [vmem:[%s841_s6 + $0x18] sm:$0xff] }
 0x203   :  { %600 = vmatprep.subr.mxu0 %v417_v63 }
 0x204   :  { %601 = vmatpush3.msra.mxu0 %v417_v63 }
 0x206   :  { %215 = vperm.xlu1 %619, %v197_v2  }
 0x275   :  { %v201_v3 = vpop.permute.xlu0 %200 }
 0x276   :  { %v218_v4 = vmul.f32 %v201_v3, %v729_v20  ;;  %v416_v3 = vld [vmem:[%s841_s6 + $0x10] sm:$0xff] }
 0x277   :  { %602 = vmatprep.subr.mxu0 %v416_v3 }
 0x278   :  { %v222_v5 = vmax.f32 %v218_v4, 0.0  ;;  %603 = vmatpush3.msra.mxu0 %v416_v3  ;;  %v415_v4 = vld [vmem:[%s841_s6 + $0x8] sm:$0xff] }
 0x279   :  { %v206_v6 = vpop.permute.xlu1 %205  ;;  %604 = vmatprep.subr.mxu0 %v415_v4 }
 0x27a   :  { %v219_v7 = vmul.f32 %v206_v6, %v735_v27  ;;  %594 = vmatprep.mubr.msk.f32.mxu1 %vm144_vm1, %v222_v5  ;;  %605 = vmatpush3.msra.mxu0 %v415_v4 }
 0x27c   :  { %v223_v8 = vmax.f32 %v219_v7, 0.0 }
 0x27d   :  { %v211_v9 = vpop.permute.xlu1 %210 }
 0x27e   :  { %v220_v10 = vmul.f32 %v211_v9, %v733_v26  ;;  %595 = vmatmul.mubr.msk.f32.vlgmr.msra.gmra.mxu1 %vm144_vm1, %v223_v8 }
 0x280   :  { %v224_v11 = vmax.f32 %v220_v10, 0.0 }
 0x281   :  { %v216_v12 = vpop.permute.xlu1 %215 }
 0x282   :  { %v221_v13 = vmul.f32 %v216_v12, %v742_v33  ;;  %597 = vmatprep.mubr.msk.f32.mxu1 %vm144_vm1, %v224_v11 }
 0x284   :  { %v225_v14 = vmax.f32 %v221_v13, 0.0 }
 0x286   :  { %598 = vmatmul.mubr.msk.f32.gmra.mxu1 %vm144_vm1, %v225_v14 }
 0x33e   :  { %v596_v16 = vpop.f32.mrf.mxu1 }
 0x33f   :  { %v321_v17 = vadd.f32 %v596_v16, %v547_v15 }
 0x340   :  { %v315_v18 = vpop.f32.mrf.mxu1 }
 0x341   :  { %v316_v19 = vadd.f32 %v547_v15, %v315_v18  ;;  %v337_v20 = vsel %vm144_vm1, %v321_v17, 0.0 }
 0x342   :  { %338 = vadd.xlane.f32.xlu0 %v337_v20  ;;  %v552_v20 = vld [vmem:[%s842_s7] ss:$0 sm:$0xff] }
 0x343   :  { %v334_v21 = vsel %vm144_vm1, %v316_v19, 0.0 }
 0x344   :  { %335 = vadd.xlane.f32.xlu1 %v334_v21 }
 0x346   :  { %v599_v22 = vpop.f32.mrf.mxu1 }
 0x347   :  { %v331_v25 = vadd.f32 %v599_v22, %v547_v15 }
 0x348   :  { %v325_v23 = vpop.f32.mrf.mxu1 }
 0x349   :  { %v326_v24 = vadd.f32 %v547_v15, %v325_v23  ;;  %v343_v27 = vsel %vm144_vm1, %v331_v25, 0.0 }
 0x34b   :  { %v340_v26 = vsel %vm144_vm1, %v326_v24, 0.0 }
 0x34c   :  { %341 = vadd.xlane.f32.xlu1 %v340_v26 }
 0x350   :  { %344 = vadd.xlane.f32.xlu1 %v343_v27 }
 0x3cb   :  { %v339_v28 = vpop.xlane.xlu0 %338 }
 0x3cc   :  { %v347_v29 = vmul.f32 0.03125, %v339_v28 }
 0x3cd   :  { %v336_v30 = vpop.xlane.xlu1 %335 }
 0x3ce   :  { %v346_v31 = vmul.f32 0.03125, %v336_v30  ;;  %v800_v32 = vsub.f32 %v321_v17, %v347_v29 }
 0x3d0   :  { %v350_v33 = vsub.f32 %v316_v19, %v346_v31  ;;  %v355_v36 = vmul.f32 %v800_v32, %v800_v32 }
 0x3d2   :  { %v354_v34 = vmul.f32 %v350_v33, %v350_v33  ;;  %v361_v40 = vsel %vm144_vm1, %v355_v36, 0.0 }
 0x3d4   :  { %v358_v35 = vsel %vm144_vm1, %v354_v34, 0.0 }
 0x3d5   :  { %359 = vadd.xlane.f32.xlu1 %v358_v35  ;;  %v342_v37 = vpop.xlane.xlu1 %341 }
 0x3d6   :  { %v348_v38 = vmul.f32 0.03125, %v342_v37 }
 0x3d8   :  { %v352_v39 = vsub.f32 %v326_v24, %v348_v38 }
 0x3d9   :  { %362 = vadd.xlane.f32.xlu1 %v361_v40  ;;  %v345_v41 = vpop.xlane.xlu1 %344 }
 0x3da   :  { %v349_v42 = vmul.f32 0.03125, %v345_v41  ;;  %v356_v43 = vmul.f32 %v352_v39, %v352_v39 }
 0x3dc   :  { %v353_v44 = vsub.f32 %v331_v25, %v349_v42  ;;  %v364_v45 = vsel %vm144_vm1, %v356_v43, 0.0 }
 0x3dd   :  { %365 = vadd.xlane.f32.xlu0 %v364_v45 }
 0x3de   :  { %v357_v46 = vmul.f32 %v353_v44, %v353_v44 }
 0x3e0   :  { %v367_v47 = vsel %vm144_vm1, %v357_v46, 0.0 }
 0x3e1   :  { %368 = vadd.xlane.f32.xlu1 %v367_v47 }
 0x45e   :  { %v360_v48 = vpop.xlane.xlu1 %359 }
 0x45f   :  { %v370_v49 = vmul.f32 0.03125, %v360_v48 }
 0x461   :  { %v374_v50 = vadd.f32 1e-05, %v370_v49 }
 0x462   :  { %v363_v52 = vpop.xlane.xlu1 %362 }
 0x463   :  { %628 = vrsqrt.f32 %v374_v50  ;;  %v371_v53 = vmul.f32 0.03125, %v363_v52 }
 0x465   :  { %v375_v54 = vadd.f32 1e-05, %v371_v53 }
 0x466   :  { %v366_v55 = vpop.xlane.xlu0 %365 }
 0x467   :  { %630 = vrsqrt.f32 %v375_v54  ;;  %v372_v57 = vmul.f32 0.03125, %v366_v55 }
 0x469   :  { %v376_v58 = vadd.f32 1e-05, %v372_v57 }
 0x46a   :  { %v369_v59 = vpop.xlane.xlu1 %368 }
 0x46b   :  { %632 = vrsqrt.f32 %v376_v58  ;;  %v373_v60 = vmul.f32 0.03125, %v369_v59 }
 0x46d   :  { %v377_v61 = vadd.f32 1e-05, %v373_v60 }
 0x46f   :  { %634 = vrsqrt.f32 %v377_v61 }
 0x470   :  { %v629_v0 = vpop.eup %628 }
 0x471   :  { %v382_v2 = vmul.f32 %v629_v0, %v752_v51  ;;  %v414_v51 = vld [vmem:[%s841_s6] sm:$0xff] }
 0x472   :  { %606 = vmatprep.subr.mxu0 %v414_v51 }
 0x473   :  { %388 = vperm.xlu0 %618, %v382_v2   ;;  %607 = vmatpush3.msra.mxu0 %v414_v51 }
 0x474   :  { %v631_v5 = vpop.eup %630 }
 0x475   :  { %v383_v6 = vmul.f32 %v631_v5, %v764_v56 }
 0x477   :  { %393 = vperm.xlu1 %619, %v383_v6  }
 0x478   :  { %v633_v7 = vpop.eup %632 }
 0x479   :  { %v384_v8 = vmul.f32 %v633_v7, %v776_v62 }
 0x47b   :  { %398 = vperm.xlu1 %619, %v384_v8  }
 0x47c   :  { %v635_v9 = vpop.eup %634 }
 0x47d   :  { %v385_v10 = vmul.f32 %v635_v9, %v782_v1 }
 0x47f   :  { %403 = vperm.xlu0 %618, %v385_v10  }
 0x4ee   :  { %v389_v11 = vpop.permute.xlu0 %388 }
 0x4ef   :  { %v406_v12 = vmul.f32 %v389_v11, %v350_v33 }
 0x4f1   :  { %v410_v13 = vmax.f32 %v406_v12, 0.0 }
 0x4f2   :  { %v394_v56 = vpop.permute.xlu1 %393 }
 0x4f3   :  { %v407_v14 = vmul.f32 %v394_v56, %v800_v32  ;;  %608 = vmatprep.mubr.msk.f32.mxu0 %vm144_vm1, %v410_v13 }
 0x4f5   :  { %v411_v15 = vmax.f32 %v407_v14, 0.0 }
 0x4f6   :  { %v399_v16 = vpop.permute.xlu1 %398 }
 0x4f7   :  { %v408_v17 = vmul.f32 %v399_v16, %v352_v39  ;;  %609 = vmatmul.mubr.msk.f32.vlgmr.msra.gmra.mxu0 %vm144_vm1, %v411_v15 }
 0x4f9   :  { %v412_v18 = vmax.f32 %v408_v17, 0.0 }
 0x4fa   :  { %v404_v62 = vpop.permute.xlu0 %403 }
 0x4fb   :  { %v409_v19 = vmul.f32 %v404_v62, %v353_v44  ;;  %611 = vmatprep.mubr.msk.f32.mxu0 %vm144_vm1, %v412_v18 }
 0x4fd   :  { %v413_v1 = vmax.f32 %v409_v19, 0.0 }
 0x4ff   :  { %612 = vmatmul.mubr.msk.f32.gmra.mxu0 %vm144_vm1, %v413_v1 }
 0x5b7   :  { %v610_v21 = vpop.f32.mrf.mxu0 }
 0x5b8   :  { %v509_v22 = vadd.f32 %v610_v21, %v552_v20 }
 0x5b9   :  { %v503_v23 = vpop.f32.mrf.mxu0 }
 0x5ba   :  { %523 = vst [vmem:[#allocation2 + $0x8] sm:$0xff] %v509_v22  ;;  %v504_v24 = vadd.f32 %v552_v20, %v503_v23 }
 0x5bc   :  { %522 = vst [vmem:[#allocation2] sm:$0xff] %v504_v24 }
 0x5bf   :  { %v613_v25 = vpop.f32.mrf.mxu0 }
 0x5c0   :  { %v519_v26 = vadd.f32 %v613_v25, %v552_v20 }
 0x5c1   :  { %v513_v27 = vpop.f32.mrf.mxu0 }
 0x5c2   :  { %525 = vst [vmem:[#allocation2 + $0x18] sm:$0xff] %v519_v26  ;;  %v514_v28 = vadd.f32 %v552_v20, %v513_v27 }
 0x5c4   :  { %524 = vst [vmem:[#allocation2 + $0x10] sm:$0xff] %v514_v28 }
 0x5c5   :  { %647 = shalt.err (!%p644_p4)
}
 0x5c6   :  { %s660_s7 = smov 128   ;;  %s661_s16 = smov 8  }
 0x5c7   :  { %537 = dma.vmem_to_hbm [thread:$0]  %s532_s0, 512, %s843_s8, [#allocation3], %s660_s7, %s660_s7, %s661_s16  }
 0x5c8   :  { %656 = dma.done.wait [#allocation3], 512  }
 0x5c9   :  { %657 = vsyncadd [#allocation3], 4294966784 }
 0x5ca   :  { %541 = vsyncpa [#allocation3], 1 }

</bundles_post_ra>
